<compile_context>
chip_gen: v7x
topology: tpu7x:2x2x1
jax: 0.10.0
libtpu: 0.0.40
codegen_flags: <defaults>
</compile_context>

<pallas_src>
import numpy as np
import jax
import jax.numpy as jnp
from jax.experimental import pallas as pl
from jax.experimental.pallas import tpu as pltpu


# ----------------------------------------------------------------------------
# Parameter construction (glue, plain JAX — mirrors the PyTorch init shapes)
# ----------------------------------------------------------------------------
def quaternion_init(key, in_q, out_q):
    """Deterministic JAX analogue of quaternion_init (glorot criterion)."""
    s = 1.0 / np.sqrt(2.0 * (in_q + out_q))
    k1, k2, k3, k4, k5 = jax.random.split(key, 5)
    shape = (in_q, out_q)
    # chi(4) modulus ~ sqrt(sum of 4 squared normals) * s
    normals = jax.random.normal(k1, (4,) + shape)
    modulus = s * jnp.sqrt(jnp.sum(normals * normals, axis=0))
    v_i = jax.random.uniform(k2, shape, minval=-1.0, maxval=1.0)
    v_j = jax.random.uniform(k3, shape, minval=-1.0, maxval=1.0)
    v_k = jax.random.uniform(k4, shape, minval=-1.0, maxval=1.0)
    norm = jnp.sqrt(v_i ** 2 + v_j ** 2 + v_k ** 2 + 1e-4)
    v_i, v_j, v_k = v_i / norm, v_j / norm, v_k / norm
    phase = jax.random.uniform(k5, shape, minval=-np.pi, maxval=np.pi)
    w_r = modulus * jnp.cos(phase)
    w_i = modulus * v_i * jnp.sin(phase)
    w_j = modulus * v_j * jnp.sin(phase)
    w_k = modulus * v_k * jnp.sin(phase)
    return (w_r.astype(jnp.float32), w_i.astype(jnp.float32),
            w_j.astype(jnp.float32), w_k.astype(jnp.float32))


def build_quaternion_matrix(r, i, j, k):
    """Mirror quaternion_linear's cat_kernels_4_quaternion construction.

    Each of r/i/j/k has shape (in_q, out_q); result is (4*in_q, 4*out_q).
    """
    col_r = jnp.concatenate([r, -i, -j, -k], axis=0)
    col_i = jnp.concatenate([i, r, -k, j], axis=0)
    col_j = jnp.concatenate([j, k, r, -i], axis=0)
    col_k = jnp.concatenate([k, -j, i, r], axis=0)
    return jnp.concatenate([col_r, col_i, col_j, col_k], axis=1)


def make_qdnn_params(key, input_dim, num_classes):
    assert input_dim % 4 == 0
    keys = jax.random.split(key, 5)

    def qlayer(k, in_feats, out_feats):
        r, i, j, kq = quaternion_init(k, in_feats // 4, out_feats // 4)
        w = build_quaternion_matrix(r, i, j, kq)          # (in_feats, out_feats)
        b = jnp.zeros((1, out_feats), jnp.float32)        # bias.data.fill_(0)
        return w, b

    w1, b1 = qlayer(keys[0], input_dim, 32)
    w2, b2 = qlayer(keys[1], 32, 32)
    w3, b3 = qlayer(keys[2], 32, 32)

    # nn.Linear(32, num_classes): kaiming-uniform-ish deterministic init
    bound = 1.0 / np.sqrt(32.0)
    wo = jax.random.uniform(keys[3], (32, num_classes), jnp.float32,
                            minval=-bound, maxval=bound)
    bo = jax.random.uniform(keys[4], (1, num_classes), jnp.float32,
                            minval=-bound, maxval=bound)
    return (w1, b1, w2, b2, w3, b3, wo, bo)


# ----------------------------------------------------------------------------
# Pallas kernel: fused 3x (quaternion linear + ReLU) + final (padded) linear
# ----------------------------------------------------------------------------
def qdnn_kernel(x_ref, w1_ref, b1_ref, w2_ref, b2_ref, w3_ref, b3_ref,
                wo_ref, bo_ref, o_ref):
    x = x_ref[...]
    h1 = jnp.maximum(
        jnp.dot(x, w1_ref[...], preferred_element_type=jnp.float32)
        + b1_ref[...], 0.0)
    h2 = jnp.maximum(
        jnp.dot(h1, w2_ref[...], preferred_element_type=jnp.float32)
        + b2_ref[...], 0.0)
    h3 = jnp.maximum(
        jnp.dot(h2, w3_ref[...], preferred_element_type=jnp.float32)
        + b3_ref[...], 0.0)
    out = jnp.dot(h3, wo_ref[...], preferred_element_type=jnp.float32) \
        + bo_ref[...]
    o_ref[...] = out.astype(o_ref.dtype)


def _round_up(v, m):
    return ((v + m - 1) // m) * m


def qdnn_forward(x, params, *, tile_b=512):
    """Fused QDNN forward.

    tile_b: batch rows per grid step (rounded to a multiple of 8 and clamped
    for small inputs). Weights/biases stay VMEM-resident across the whole grid
    via constant index_maps; only the x tile and the out tile are pipelined.
    """
    w1, b1, w2, b2, w3, b3, wo, bo = params
    batch, in_dim = x.shape
    h1d, h2d, h3d = w1.shape[1], w2.shape[1], w3.shape[1]
    num_classes = wo.shape[1]

    # --- lane-dense output: zero-pad the final layer to a 128-lane multiple.
    ncp = _round_up(num_classes, 128)
    wo_p = jnp.pad(wo, ((0, 0), (0, ncp - num_classes)))
    bo_p = jnp.pad(bo, ((0, 0), (0, ncp - num_classes)))

    # --- batch tiling (multiple of 8 -> f32 sublane-clean input tile)
    tile_b = max(8, min(_round_up(tile_b, 8), _round_up(batch, 8)))
    pad_batch = _round_up(batch, tile_b)
    x_p = x if pad_batch == batch else jnp.pad(x, ((0, pad_batch - batch), (0, 0)))

    grid = (pad_batch // tile_b,)

    const2d = lambda i: (0, 0)          # weights/biases: resident, DMA'd once
    in_specs = [
        pl.BlockSpec((tile_b, in_dim), lambda i: (i, 0)),   # x tile (pipelined)
        pl.BlockSpec((in_dim, h1d), const2d),
        pl.BlockSpec((1, h1d), const2d),
        pl.BlockSpec((h1d, h2d), const2d),
        pl.BlockSpec((1, h2d), const2d),
        pl.BlockSpec((h2d, h3d), const2d),
        pl.BlockSpec((1, h3d), const2d),
        pl.BlockSpec((h3d, ncp), const2d),
        pl.BlockSpec((1, ncp), const2d),
    ]
    out_specs = pl.BlockSpec((tile_b, ncp), lambda i: (i, 0))

    flops = 2 * pad_batch * (in_dim * h1d + h1d * h2d + h2d * h3d + h3d * ncp)
    weight_bytes = 4 * (w1.size + b1.size + w2.size + b2.size
                        + w3.size + b3.size + wo_p.size + bo_p.size)
    bytes_accessed = int(4 * pad_batch * in_dim          # f32 x in
                         + 4 * pad_batch * ncp           # f32 out
                         + weight_bytes)

    out = pl.pallas_call(
        qdnn_kernel,
        grid=grid,
        in_specs=in_specs,
        out_specs=out_specs,
        out_shape=jax.ShapeDtypeStruct((pad_batch, ncp), jnp.float32),
        compiler_params=pltpu.CompilerParams(
            dimension_semantics=("parallel",)),
        cost_estimate=pl.CostEstimate(flops=flops,
                                      transcendentals=0,
                                      bytes_accessed=bytes_accessed),
    )(x_p, w1, b1, w2, b2, w3, b3, wo_p, bo_p)

    # Slice off batch padding and the lane padding of the output.
    return out[:batch, :num_classes]


# ----------------------------------------------------------------------------
# Pure-JAX reference (for a correctness sanity check)
# ----------------------------------------------------------------------------
def qdnn_ref(x, params):
    w1, b1, w2, b2, w3, b3, wo, bo = params
    h = jnp.maximum(x @ w1 + b1, 0.0)
    h = jnp.maximum(h @ w2 + b2, 0.0)
    h = jnp.maximum(h @ w3 + b3, 0.0)
    return h @ wo + bo


if __name__ == "__main__":
    input_dim = 16      # must be a multiple of 4 (quaternion layers)
    num_classes = 10
    batch = 64          # small, but enough to exercise a multi-step grid

    key = jax.random.PRNGKey(0)
    k_params, k_x = jax.random.split(key)
    params = make_qdnn_params(k_params, input_dim, num_classes)
    x = jax.random.normal(k_x, (batch, input_dim), jnp.float32)

    # tile_b=16 -> grid of 4 batch tiles in this small demo
    out = jax.block_until_ready(qdnn_forward(x, params, tile_b=16))
    ref = jax.block_until_ready(qdnn_ref(x, params))

    assert out.shape == (batch, num_classes)
    np.testing.assert_allclose(np.asarray(out), np.asarray(ref),
                               rtol=1e-5, atol=1e-5)
    print("KERNEL_OK")
</pallas_src>

<mosaic_0001>
module attributes {stable_mosaic.version = 11 : i64} {
  func.func @qdnn_kernel(%arg0: i32, %arg1: memref<16x16xf32, #tpu.memory_space<vmem>>, %arg2: memref<16x32xf32, #tpu.memory_space<vmem>>, %arg3: memref<1x32xf32, #tpu.memory_space<vmem>>, %arg4: memref<32x32xf32, #tpu.memory_space<vmem>>, %arg5: memref<1x32xf32, #tpu.memory_space<vmem>>, %arg6: memref<32x32xf32, #tpu.memory_space<vmem>>, %arg7: memref<1x32xf32, #tpu.memory_space<vmem>>, %arg8: memref<32x128xf32, #tpu.memory_space<vmem>>, %arg9: memref<1x128xf32, #tpu.memory_space<vmem>>, %arg10: memref<16x128xf32, #tpu.memory_space<vmem>>) attributes {dimension_semantics = [#tpu.dimension_semantics<parallel>], iteration_bounds = array<i64: 4>, scalar_prefetch = 0 : i64, scratch_operands = 0 : i64, tpu.core_type = #tpu.core_type<tc>, window_params = [{transform_indices = @transform_0, window_bounds = array<i64: 16, 16>}, {pipeline_mode = #tpu.pipeline_mode<synchronous>, transform_indices = @transform_1, window_bounds = array<i64: 16, 32>}, {pipeline_mode = #tpu.pipeline_mode<synchronous>, transform_indices = @transform_2, window_bounds = array<i64: 1, 32>}, {pipeline_mode = #tpu.pipeline_mode<synchronous>, transform_indices = @transform_3, window_bounds = array<i64: 32, 32>}, {pipeline_mode = #tpu.pipeline_mode<synchronous>, transform_indices = @transform_4, window_bounds = array<i64: 1, 32>}, {pipeline_mode = #tpu.pipeline_mode<synchronous>, transform_indices = @transform_5, window_bounds = array<i64: 32, 32>}, {pipeline_mode = #tpu.pipeline_mode<synchronous>, transform_indices = @transform_6, window_bounds = array<i64: 1, 32>}, {pipeline_mode = #tpu.pipeline_mode<synchronous>, transform_indices = @transform_7, window_bounds = array<i64: 32, 128>}, {pipeline_mode = #tpu.pipeline_mode<synchronous>, transform_indices = @transform_8, window_bounds = array<i64: 1, 128>}, {transform_indices = @transform_9, window_bounds = array<i64: 16, 128>}]} {
    %c0 = arith.constant 0 : index
    %c0_0 = arith.constant 0 : index
    %0 = vector.load %arg1[%c0, %c0_0] : memref<16x16xf32, #tpu.memory_space<vmem>>, vector<16x16xf32>
    %c0_1 = arith.constant 0 : index
    %c0_2 = arith.constant 0 : index
    %1 = vector.load %arg2[%c0_1, %c0_2] : memref<16x32xf32, #tpu.memory_space<vmem>>, vector<16x32xf32>
    %cst = arith.constant dense<0.000000e+00> : vector<16x32xf32>
    %2 = tpu.matmul %0, %1, %cst {dimension_numbers = #tpu.dot_dimension_numbers<[1], [0], [0], [1], [0, 0, 1, 1], [], []>} : vector<16x16xf32>, vector<16x32xf32>, vector<16x32xf32> -> vector<16x32xf32>
    %c0_3 = arith.constant 0 : index
    %c0_4 = arith.constant 0 : index
    %3 = vector.load %arg3[%c0_3, %c0_4] : memref<1x32xf32, #tpu.memory_space<vmem>>, vector<1x32xf32>
    %4 = vector.broadcast %3 : vector<1x32xf32> to vector<16x32xf32>
    %5 = arith.addf %2, %4 : vector<16x32xf32>
    %cst_5 = arith.constant 0.000000e+00 : f32
    %6 = vector.broadcast %cst_5 : f32 to vector<16x32xf32>
    %7 = arith.maximumf %5, %6 : vector<16x32xf32>
    %c0_6 = arith.constant 0 : index
    %c0_7 = arith.constant 0 : index
    %8 = vector.load %arg4[%c0_6, %c0_7] : memref<32x32xf32, #tpu.memory_space<vmem>>, vector<32x32xf32>
    %cst_8 = arith.constant dense<0.000000e+00> : vector<16x32xf32>
    %9 = tpu.matmul %7, %8, %cst_8 {dimension_numbers = #tpu.dot_dimension_numbers<[1], [0], [0], [1], [0, 0, 1, 1], [], []>} : vector<16x32xf32>, vector<32x32xf32>, vector<16x32xf32> -> vector<16x32xf32>
    %c0_9 = arith.constant 0 : index
    %c0_10 = arith.constant 0 : index
    %10 = vector.load %arg5[%c0_9, %c0_10] : memref<1x32xf32, #tpu.memory_space<vmem>>, vector<1x32xf32>
    %11 = vector.broadcast %10 : vector<1x32xf32> to vector<16x32xf32>
    %12 = arith.addf %9, %11 : vector<16x32xf32>
    %cst_11 = arith.constant 0.000000e+00 : f32
    %13 = vector.broadcast %cst_11 : f32 to vector<16x32xf32>
    %14 = arith.maximumf %12, %13 : vector<16x32xf32>
    %c0_12 = arith.constant 0 : index
    %c0_13 = arith.constant 0 : index
    %15 = vector.load %arg6[%c0_12, %c0_13] : memref<32x32xf32, #tpu.memory_space<vmem>>, vector<32x32xf32>
    %cst_14 = arith.constant dense<0.000000e+00> : vector<16x32xf32>
    %16 = tpu.matmul %14, %15, %cst_14 {dimension_numbers = #tpu.dot_dimension_numbers<[1], [0], [0], [1], [0, 0, 1, 1], [], []>} : vector<16x32xf32>, vector<32x32xf32>, vector<16x32xf32> -> vector<16x32xf32>
    %c0_15 = arith.constant 0 : index
    %c0_16 = arith.constant 0 : index
    %17 = vector.load %arg7[%c0_15, %c0_16] : memref<1x32xf32, #tpu.memory_space<vmem>>, vector<1x32xf32>
    %18 = vector.broadcast %17 : vector<1x32xf32> to vector<16x32xf32>
    %19 = arith.addf %16, %18 : vector<16x32xf32>
    %cst_17 = arith.constant 0.000000e+00 : f32
    %20 = vector.broadcast %cst_17 : f32 to vector<16x32xf32>
    %21 = arith.maximumf %19, %20 : vector<16x32xf32>
    %c0_18 = arith.constant 0 : index
    %c0_19 = arith.constant 0 : index
    %22 = vector.load %arg8[%c0_18, %c0_19] : memref<32x128xf32, #tpu.memory_space<vmem>>, vector<32x128xf32>
    %cst_20 = arith.constant dense<0.000000e+00> : vector<16x128xf32>
    %23 = tpu.matmul %21, %22, %cst_20 {dimension_numbers = #tpu.dot_dimension_numbers<[1], [0], [0], [1], [0, 0, 1, 1], [], []>} : vector<16x32xf32>, vector<32x128xf32>, vector<16x128xf32> -> vector<16x128xf32>
    %c0_21 = arith.constant 0 : index
    %c0_22 = arith.constant 0 : index
    %24 = vector.load %arg9[%c0_21, %c0_22] : memref<1x128xf32, #tpu.memory_space<vmem>>, vector<1x128xf32>
    %25 = vector.broadcast %24 : vector<1x128xf32> to vector<16x128xf32>
    %26 = arith.addf %23, %25 : vector<16x128xf32>
    %c0_23 = arith.constant 0 : index
    %c0_24 = arith.constant 0 : index
    %27 = vector.load %arg10[%c0_23, %c0_24] : memref<16x128xf32, #tpu.memory_space<vmem>>, vector<16x128xf32>
    tpu.vector_store %arg10[%c0_23, %c0_24], %26 {strides = array<i32>} : memref<16x128xf32, #tpu.memory_space<vmem>>, vector<16x128xf32>,
    return
  }
  func.func @transform_0(%arg0: i32) -> (i32, i32) {
    %c0_i32 = arith.constant 0 : i32
    %c0_i32_0 = arith.constant 0 : i32
    return %arg0, %c0_i32 : i32, i32
  }
  func.func @transform_1(%arg0: i32) -> (i32, i32) {
    %c0_i32 = arith.constant 0 : i32
    %c0_i32_0 = arith.constant 0 : i32
    %c0_i32_1 = arith.constant 0 : i32
    return %c0_i32, %c0_i32_0 : i32, i32
  }
  func.func @transform_2(%arg0: i32) -> (i32, i32) {
    %c0_i32 = arith.constant 0 : i32
    %c0_i32_0 = arith.constant 0 : i32
    %c0_i32_1 = arith.constant 0 : i32
    return %c0_i32, %c0_i32_0 : i32, i32
  }
  func.func @transform_3(%arg0: i32) -> (i32, i32) {
    %c0_i32 = arith.constant 0 : i32
    %c0_i32_0 = arith.constant 0 : i32
    %c0_i32_1 = arith.constant 0 : i32
    return %c0_i32, %c0_i32_0 : i32, i32
  }
  func.func @transform_4(%arg0: i32) -> (i32, i32) {
    %c0_i32 = arith.constant 0 : i32
    %c0_i32_0 = arith.constant 0 : i32
    %c0_i32_1 = arith.constant 0 : i32
    return %c0_i32, %c0_i32_0 : i32, i32
  }
  func.func @transform_5(%arg0: i32) -> (i32, i32) {
    %c0_i32 = arith.constant 0 : i32
    %c0_i32_0 = arith.constant 0 : i32
    %c0_i32_1 = arith.constant 0 : i32
    return %c0_i32, %c0_i32_0 : i32, i32
  }
  func.func @transform_6(%arg0: i32) -> (i32, i32) {
    %c0_i32 = arith.constant 0 : i32
    %c0_i32_0 = arith.constant 0 : i32
    %c0_i32_1 = arith.constant 0 : i32
    return %c0_i32, %c0_i32_0 : i32, i32
  }
  func.func @transform_7(%arg0: i32) -> (i32, i32) {
    %c0_i32 = arith.constant 0 : i32
    %c0_i32_0 = arith.constant 0 : i32
    %c0_i32_1 = arith.constant 0 : i32
    return %c0_i32, %c0_i32_0 : i32, i32
  }
  func.func @transform_8(%arg0: i32) -> (i32, i32) {
    %c0_i32 = arith.constant 0 : i32
    %c0_i32_0 = arith.constant 0 : i32
    %c0_i32_1 = arith.constant 0 : i32
    return %c0_i32, %c0_i32_0 : i32, i32
  }
  func.func @transform_9(%arg0: i32) -> (i32, i32) {
    %c0_i32 = arith.constant 0 : i32
    %c0_i32_0 = arith.constant 0 : i32
    return %arg0, %c0_i32 : i32, i32
  }
}

</mosaic_0001>

<bundles_post_ra>
// kernel: tpu_custom_call.1
= control target key start
LH: loop header
LB: loop body
LE: loop exit
PB: predicated region body
PF: predicated region fallthrough
CT: control target
= control target key end

     0   :  { %14 = vsyncpa [#allocation3], 0  ;;  %s1329_s0 = inlined_call_operand.vmem [shape: f32[64,16], index: 0, kind: input, shape index: {}]   ;;  %s1330_s1 = inlined_call_operand.hbm [shape: f32[16,32], index: 1, kind: input, shape index: {}]   ;;  %s1331_s2 = inlined_call_operand.vmem [shape: f32[1,32], index: 2, kind: input, shape index: {}]   ;;  %s1332_s3 = inlined_call_operand.vmem [shape: f32[32,32], index: 3, kind: input, shape index: {}]   ;;  %s1333_s4 = inlined_call_operand.vmem [shape: f32[1,32], index: 4, kind: input, shape index: {}]   ;;  %s1334_s5 = inlined_call_operand.vmem [shape: f32[32,32], index: 5, kind: input, shape index: {}]   ;;  %s1335_s6 = inlined_call_operand.vmem [shape: f32[1,32], index: 6, kind: input, shape index: {}]   ;;  %s1336_s7 = inlined_call_operand.vmem [shape: f32[32,128], index: 7, kind: input, shape index: {}]   ;;  %s1337_s8 = inlined_call_operand.vmem [shape: f32[1,128], index: 8, kind: input, shape index: {}]   ;;  %s1338_s9 = inlined_call_operand.hbm [shape: f32[64,128], index: 9, kind: output, shape index: {}]  }
   0x1   :  { %15 = vsyncpa [#allocation4], 0 }
   0x2   :  { %17 = vsyncpa [#allocation4 + $0x1], 0  ;;  %s1138_s30 = smov 0   ;;  %s1140_s10 = smov 0  }
   0x3   :  { %s1142_s11 = smov 0   ;;  %s1144_s12 = smov 0  }
   0x4 LB: > { %s1159_s13 = sadd.s32 4294967295, %s1080_s12   ;;  %s815_s14 = sadd.s32 4294967294, %s1080_s12   ;;  %s1080_s12 = sphi %s1144_s12, %s1354_s12   ;;  %s1076_s11 = sphi %s1142_s11, %s1353_s11   ;;  %s1072_s10 = sphi %s1140_s10, %s1352_s10   ;;  %s1068_s30 = sphi %s1138_s30, %s1351_s30  }
   0x5   : > { %s1163_s15 = sadd.s32 1, %s1080_s12   ;;  %s224_s16 = sadd.s32 1, %s1076_s11 }
   0x6   : > { %s221_s17 = ssub.s32 %s1080_s12, %s1163_s15  ;;  %p234_p0 = scmp.ne.s32.totalorder %s1076_s11, %s1072_s10 }
   0x7   : > { %p222_p1 = scmp.eq.s32.totalorder %s221_s17, 0  ;;  %p235_p2 = scmp.eq.s32.totalorder %s1159_s13, 3 }
   0x8   : > { %p240_p3 = scmp.ne.s32.totalorder %s1072_s10, %s1068_s30  ;;  %p241_p4 = scmp.eq.s32.totalorder %s815_s14, 3 }
   0x9   : > { %s1174_s18 = scalar_select %p222_p1, %s1076_s11, %s224_s16  }
   0xa   : > { %p1176_p5 = por %p235_p2, %p234_p0  ;;  %p1180_p6 = por %p241_p4, %p240_p3 }
   0xb   : > { %p816_p7 = scmp.ge.s32.totalorder %s1080_s12, 1  ;;  %p248_p8 = scmp.lt.s32.totalorder %s1080_s12, 5 }
   0xc   : > { %s1342_s19 = scalar_select %p1176_p5, 1, 0 }
   0xd   : > { %s1343_s20 = scalar_select %p1180_p6, 1, 0 }
   0xe   : > { %p1339_p9 = scmp.eq.s32.totalorder %s1159_s13, 0  ;;  %p1187_p10 = pnand %p816_p7, %p248_p8 }
   0xf   : > { %s1082_s22 = smov [#allocation2]   ;;  %s986_s27 = scalar_lea.hbm %s1330_s1, 256 }
  0x10   : > { %s1344_s21 = scalar_select %p1187_p10, 1, 0 }
  0x11   : > { %s260_s23 = sshll.u32 %s1082_s22, 4  ;;  %p938_p11 = pneg %p1187_p10  ;;  %s261_s23 = int_to_ptr.vmem [resolvable:$true] %s260_s23 }
  0x12   : > { %p987_p13 = scmp.ne.s32.totalorder %s1330_s1, %s986_s27  ;;  %p993_p3 = scmp.lt.u32.totalorder %s986_s27, %s1330_s1 }
  0x13   : > { %p1195_p12 = pnand %p1339_p9, %p938_p11 }
  0x15   : > { %p988_p0 = pneg %p1195_p12 }
  0x17   : > { %p989_p1 = pnand %p988_p0, %p987_p13 }
  0x19   : > { %p990_p2 = pneg %p989_p1 }
  0x1b   : > { %p995_p4 = pnand %p993_p3, %p990_p2 }
  0x1d   : > { %998 = shalt.err (!%p995_p4)
}
  0x1e   : > { %s999_s17 = scalar_lea.vmem %s261_s23, 256  ;;  %p1007_p9 = scmp.lt.s32.totalorder %s261_s23, %s261_s23 }
  0x1f   : > { %p1000_p7 = scmp.ne.s32.totalorder %s261_s23, %s999_s17  ;;  %p1008_p6 = scmp.lt.s32.totalorder %s999_s17, %s999_s17 }
  0x21   : > { %p1002_p8 = pnand %p1000_p7, %p988_p0  ;;  %p1009_p5 = por %p1008_p6, %p1007_p9 }
  0x23   : > { %p1003_p11 = pneg %p1002_p8 }
  0x25   : > { %p1010_p10 = pnand %p1009_p5, %p1003_p11 }
  0x27   : > { %1013 = shalt.err (!%p1010_p10)
}
  0x28   : > { %s1083_s22 = smov 128   ;;  %s1084_s25 = smov 8  }
  0x29   : > { %941 = dma.hbm_to_vmem [thread:$0]  (!%p1195_p12), %s1330_s1, 256, %s261_s23, [#allocation3], %s1083_s22, %s1083_s22, %s1084_s25  }
  0x2a   : > { %p1346_p13 = scmp.ne.s32.totalorder %s1344_s21, 0 }
  0x2b   : > { %p1347_p1 = scmp.eq.s32.totalorder (!%p1346_p13), %s1159_s13, 0 }
  0x2c   : > { %306 = sbr.rel (%p1346_p13) target bundleno = 944 (0x3b0), region = 56 }
  0x33   : > { %1059 = dma.done.wait (%p1347_p1), [#allocation3], 256   ;;  %p1348_p0 = pmov %p1347_p1 }
  0x34   : > { %s822_s27 = sshll.u32 %s1159_s13, 1  ;;  %vm360_vm0 = vcmask 130048   ;;  %v351_v0 = vld [vmem:[#allocation2] sm:$0xff]  ;;  %v352_v1 = vld [vmem:[#allocation2 + $0x8] sm:$0xff]  ;;  %v446_v8 = vld [vmem:[%s1332_s3 + $0x10] sm:$0xff]  ;;  %vm455_vm1 = vcmask 261120  }
  0x35   : > { %1061 = vsyncadd (%p1348_p0), [#allocation3], 4294967040  ;;  %p343_p5 = scmp.lt.s32.totalorder %s822_s27, 7  ;;  %v904_v3 = vpack.c.bf16 %v352_v1, %v351_v0  ;;  %v444_v4 = vld [vmem:[%s1332_s3] sm:$0xff]  ;;  %v445_v5 = vld [vmem:[%s1332_s3 + $0x8] sm:$0xff]  ;;  %s339_s28 = sand.u32 1, %s1072_s10  }
  0x36   : > { %v908_v6 = vpack.c.bf16 %v445_v5, %v444_v4  ;;  %v447_v9 = vld [vmem:[%s1332_s3 + $0x18] sm:$0xff]  ;;  %v539_v11 = vld [vmem:[%s1334_s5] sm:$0xff]  ;;  %v540_v12 = vld [vmem:[%s1334_s5 + $0x8] sm:$0xff]  ;;  %s841_s21 = sshll.u32 %s1159_s13, 8  ;;  %s1288_s25 = scalar_lea.sflag [#allocation4], %s339_s28 }
  0x37   : > { %s1356_s27 = smov (!%p343_p5, %s822_s27), 7  ;;  %905 = vmatprep.subr.bf16.mxu0 %v904_v3  ;;  %v912_v10 = vpack.c.bf16 %v447_v9, %v446_v8  ;;  %v916_v13 = vpack.c.bf16 %v540_v12, %v539_v11  ;;  %v824_v14 = vld [vmem:[%s1331_s2] ss:$0 sm:$0xff]  ;;  %v541_v21 = vld [vmem:[%s1334_s5 + $0x10] sm:$0xff]  ;;  %v542_v22 = vld [vmem:[%s1334_s5 + $0x18] sm:$0xff]  ;;  %s1286_s22 = scalar_lea.hbm %s1338_s9, %s841_s21 }
  0x38   : > { %s823_s29 = sshll.u32 %s1356_s27, 3  ;;  %907 = vmatpush3.bf16.msra.mxu0 %v904_v3  ;;  %909 = vmatprep.subr.bf16.mxu1 %v908_v6  ;;  %v920_v23 = vpack.c.bf16 %v542_v22, %v541_v21  ;;  %v633_v24 = vld [vmem:[%s1336_s7] sm:$0xff]  ;;  %v634_v25 = vld [vmem:[%s1336_s7 + $0x8] sm:$0xff]  ;;  %v635_v34 = vld [vmem:[%s1336_s7 + $0x10] sm:$0xff]  ;;  %s821_s27 = sshll.u32 %s339_s28, 4 }
  0x39   : > { %s346_s16 = scalar_lea.vmem %s1329_s0, %s823_s29  ;;  %911 = vmatpush3.bf16.msra.mxu1 %v908_v6  ;;  %917 = vmatprep.subr.bf16.mxu0 %v916_v13  ;;  %v924_v26 = vpack.c.bf16 %v634_v25, %v633_v24  ;;  %v827_v27 = vld [vmem:[%s1333_s4] ss:$0 sm:$0xff]  ;;  %v636_v35 = vld [vmem:[%s1336_s7 + $0x18] sm:$0xff]  ;;  %s341_s14 = scalar_lea.vmem [#allocation5], %s821_s27 }
  0x3a   : > { %v349_v2 = vld [vmem:[%s346_s16] sm:$0xff]  ;;  %v350_v7 = vld [vmem:[%s346_s16 + $0x8] sm:$0xff]  ;;  %913 = vmatprep.subr.bf16.mxu1 %v912_v10  ;;  %v928_v36 = vpack.c.bf16 %v636_v35, %v635_v34  ;;  %s741_s16 = sshll.u32 %s341_s14, 4  ;;  %p1349_p9 = scmp.ne.s32.totalorder %s1342_s19, 0  ;;  %s1281_s16 = int_to_ptr.vmem [resolvable:$true] %s741_s16 }
  0x3b   : > { %868 = vmatprep.mubr.msk.f32.mxu0 %vm360_vm0, %v349_v2  ;;  %v830_v37 = vld [vmem:[%s1335_s6] ss:$0 sm:$0xff]  ;;  %s1014_s26 = scalar_lea.vmem %s1281_s16, 256  ;;  %s1085_s13 = smov [#allocation5]  }
  0x3c   : > { %869 = vmatmul.mubr.msk.f32.vlgmr.msra.gmra.mrb[0].mxu0 %vm360_vm0, %v350_v7  ;;  %v833_v44 = vld [vmem:[%s1337_s8] ss:$0 sm:$0xff]  ;;  %p1015_p6 = scmp.ne.s32.totalorder %s1281_s16, %s1014_s26  ;;  %s1018_s27 = sshll.u32 %s1085_s13, 4  ;;  %s1019_s27 = int_to_ptr.vmem [resolvable:$false] %s1018_s27 }
  0x3d   : > { %915 = vmatpush3.bf16.msra.mxu1 %v912_v10  ;;  %919 = vmatpush3.bf16.msra.mxu0 %v916_v13  ;;  %s1020_s29 = scalar_lea.vmem %s1019_s27, 512  ;;  %p1021_p2 = scmp.lt.s32.totalorder %s1281_s16, %s1019_s27 }
  0x3e   : > { %921 = vmatprep.subr.bf16.mxu0 %v920_v23  ;;  %925 = vmatprep.subr.bf16.mxu1 %v924_v26  ;;  %p1016_p10 = pnand %p1015_p6, %p1349_p9  ;;  %p1022_p3 = scmp.lt.s32.totalorder %s1020_s29, %s1014_s26 }
  0x40   : > { %p1017_p12 = pneg %p1016_p10  ;;  %p1023_p4 = por %p1022_p3, %p1021_p2 }
  0x41   : > { %923 = vmatpush3.bf16.msra.mxu0 %v920_v23 }
  0x42   : > { %p1024_p7 = pnand %p1023_p4, %p1017_p12 }
 0x10f   : > { %v870_v15 = vpop.f32.mrb[0].mxu0 }
 0x110   : > { %v439_v16 = vadd.f32 %v870_v15, %v824_v14  ;;  %v433_v17 = vpop.f32.mrb[1].mxu0 }
 0x111   : > { %v434_v18 = vadd.f32 %v824_v14, %v433_v17 }
 0x112   : > { %v443_v20 = vmax.f32 %v439_v16, 0.0 }
 0x113   : > { %v442_v19 = vmax.f32 %v434_v18, 0.0 }
 0x115   : > { %879 = vmatprep.mubr.msk.f32.mxu1 %vm455_vm1, %v442_v19 }
 0x116   : > { %880 = vmatmul.mubr.msk.f32.vlgmr.msra.gmra.mrb[0].mxu1 %vm455_vm1, %v443_v20 }
 0x117   : > { %927 = vmatpush3.bf16.msra.mxu1 %v924_v26 }
 0x118   : > { %929 = vmatprep.subr.bf16.mxu1 %v928_v36 }
 0x11b   : > { %931 = vmatpush3.bf16.msra.mxu1 %v928_v36 }
 0x1e9   : > { %v881_v28 = vpop.f32.mrb[0].mxu1 }
 0x1ea   : > { %v534_v29 = vadd.f32 %v881_v28, %v827_v27  ;;  %v528_v30 = vpop.f32.mrb[1].mxu1 }
 0x1eb   : > { %v529_v31 = vadd.f32 %v827_v27, %v528_v30 }
 0x1ec   : > { %v538_v33 = vmax.f32 %v534_v29, 0.0 }
 0x1ed   : > { %v537_v32 = vmax.f32 %v529_v31, 0.0 }
 0x1ef   : > { %890 = vmatprep.mubr.msk.f32.mxu0 %vm455_vm1, %v537_v32 }
 0x1f0   : > { %891 = vmatmul.mubr.msk.f32.vlgmr.msra.gmra.mrb[2].mxu0 %vm455_vm1, %v538_v33 }
 0x2c3   : > { %v892_v38 = vpop.f32.mrb[2].mxu0 }
 0x2c4   : > { %v628_v39 = vadd.f32 %v892_v38, %v830_v37  ;;  %v622_v40 = vpop.f32.mrb[3].mxu0 }
 0x2c5   : > { %v623_v41 = vadd.f32 %v830_v37, %v622_v40 }
 0x2c6   : > { %v632_v43 = vmax.f32 %v628_v39, 0.0 }
 0x2c7   : > { %v631_v42 = vmax.f32 %v623_v41, 0.0 }
 0x2c9   : > { %901 = vmatprep.mubr.msk.f32.mxu1 %vm455_vm1, %v631_v42 }
 0x2ca   : > { %902 = vmatmul.mubr.msk.f32.vlgmr.msra.gmra.mrb[2].mxu1 %vm455_vm1, %v632_v43 }
 0x39d   : > { %v903_v45 = vpop.f32.mrb[2].mxu1 }
 0x39e   : > { %v722_v46 = vadd.f32 %v903_v45, %v833_v44  ;;  %v716_v47 = vpop.f32.mrb[3].mxu1 }
 0x39f   : > { %v717_v48 = vadd.f32 %v833_v44, %v716_v47 }
 0x3a0   : > { %726 = vst [vmem:[%s341_s14 + $0x8] sm:$0xff] %v722_v46 }
 0x3a1   : > { %725 = vst [vmem:[%s341_s14] sm:$0xff] %v717_v48 }
 0x3a2   : > { %1027 = shalt.err (!%p1024_p7)
}
 0x3a3   : > { %s1028_s28 = scalar_lea.hbm %s1286_s22, 256  ;;  %s1032_s21 = scalar_lea.hbm %s1338_s9, 1024 }
 0x3a4   : > { %p1029_p8 = scmp.ne.s32.totalorder %s1286_s22, %s1028_s28  ;;  %p1033_p1 = scmp.lt.u32.totalorder %s1286_s22, %s1338_s9 }
 0x3a5   : > { %p1034_p0 = scmp.lt.u32.totalorder %s1032_s21, %s1028_s28  ;;  %p1036_p6 = scmp.lt.u32.totalorder %s1028_s28, %s1286_s22 }
 0x3a6   : > { %p1030_p11 = pnand %p1029_p8, %p1349_p9 }
 0x3a7   : > { %p1035_p5 = por %p1034_p0, %p1033_p1 }
 0x3a8   : > { %p1031_p13 = pneg %p1030_p11 }
 0x3a9   : > { %p1037_p10 = por %p1036_p6, %p1035_p5 }
 0x3ab   : > { %p1038_p12 = pnand %p1037_p10, %p1031_p13 }
 0x3ad   : > { %1041 = shalt.err (!%p1038_p12)
}
 0x3ae   : > { %s1086_s26 = smov 128   ;;  %s1087_s13 = smov 8  }
 0x3af   : > { %936 = dma.vmem_to_hbm [thread:$0]  (%p1349_p9), %s1281_s16, 256, %s1286_s22, %s1288_s25, %s1086_s26, %s1086_s26, %s1087_s13  }
 0x3b0 PF: > { %p948_p2 = scmp.ge.s32.totalorder %s1080_s12, 2  ;;  %s756_s27 = sand.u32 1, %s1068_s30  }
 0x3b1   : > { %p1350_p3 = scmp.ne.s32.totalorder %s1343_s20, 0  ;;  %s757_s29 = scalar_lea.sflag [#allocation4], %s756_s27 }
 0x3b3   : > { %p943_p4 = pnand %p948_p2, %p1350_p3 }
 0x3b5   : > { %1063 = dma.done.wait (!%p943_p4), %s757_s29, 256  }
 0x3b6   : > { %1065 = vsyncadd (!%p943_p4), %s757_s29, 4294967040  ;;  %p20_p7 = scmp.ge.s32.totalorder %s1163_s15, 6   ;;  %s1351_s30 = smov %s1072_s10 }
 0x3b7   : > { %s1352_s10 = smov %s1076_s11  ;;  %s1353_s11 = smov %s1174_s18 }
 0x3b8   : > { %s1354_s12 = smov %s1163_s15  ;;  %22 = sbr.rel (!%p20_p7) target bundleno = 4 (0x4), region = 96 }
 0x3bf   :  { %762 = vsyncpa [#allocation3], 1 }
 0x3c0   :  { %764 = vsyncpa [#allocation3 + $0x1], 1 }
 0x3c1   :  { %765 = vsyncpa [#allocation4], 1 }
 0x3c2   :  { %767 = vsyncpa [#allocation4 + $0x1], 1 }

</bundles_post_ra>
